<compile_context>
chip_gen: v6e
topology: v6e:2x2x1
jax: 0.10.0
libtpu: 0.0.40
codegen_flags: <defaults>
</compile_context>

<pallas_src>
import functools

import jax
import jax.numpy as jnp
from jax.experimental import pallas as pl
from jax.experimental.pallas import tpu as pltpu


def _round_up(x, m):
    return ((x + m - 1) // m) * m


def _src_embed_kernel(x_ref, w_ref, p_ref, o_ref, *, eps, d_model):
    # Linear (MXU): y = x @ W + b, f32 accumulation.
    y = jnp.dot(x_ref[...], w_ref[...], preferred_element_type=jnp.float32)
    y = y + p_ref[0:1, :]                                   # + bias

    # Two-pass row statistics on the VMEM-resident tile.
    mean = jnp.sum(y, axis=-1, keepdims=True) * (1.0 / float(d_model))
    diff = y - mean
    # torch.Tensor.std is unbiased (ddof=1).
    var = jnp.sum(diff * diff, axis=-1, keepdims=True) * (1.0 / (d_model - 1.0))
    std = jnp.sqrt(var)
    # eps is added OUTSIDE the sqrt (matches the custom PyTorch LayerNorm).
    inv = pl.reciprocal(std + eps, approx=True)             # per-row, EUP slot

    out = p_ref[1:2, :] * (diff * inv) + p_ref[2:3, :]      # gamma, beta
    o_ref[...] = out.astype(o_ref.dtype)


def src_embed(x, w, b, gamma, beta, *, eps=1e-6, tile_rows=512,
              compute_dtype=jnp.bfloat16):
    """x: [B, S, input_dim]; w: [input_dim, d_model] (transpose of the
    nn.Linear weight); b / gamma / beta: [d_model].

    compute_dtype: dtype of the MXU operands (x, w).  Defaults to bf16 (half
    the input DMA bytes, native MXU width on v5e/v6e/v7x; the cast is free if
    the caller already holds bf16 activations/weights).  Matmul accumulation
    and all LayerNorm math stay in f32.  Pass jnp.float32 for bit-faithful
    Linear numerics.
    """
    B, S, D_in = x.shape
    D_in_w, D_model = w.shape
    assert D_in_w == D_in
    assert D_model > 1, "unbiased std needs d_model > 1"
    N = B * S

    in_dtype = jnp.dtype(compute_dtype if compute_dtype is not None else x.dtype)
    out_dtype = x.dtype

    # No HBM padding / slicing: trailing block dims equal the full array dims.
    x2 = x.reshape(N, D_in).astype(in_dtype)
    w2 = w.astype(in_dtype)
    # One packed (3, d_model) f32 operand: [bias; gamma; beta].
    params = jnp.stack([b.astype(jnp.float32),
                        gamma.astype(jnp.float32),
                        beta.astype(jnp.float32)], axis=0)

    # Row tile: multiple of 8 (sublane), as large as the problem allows, but
    # split into >= 2 row blocks when N >= 16 so the "parallel" axis can use
    # both TensorCores on v7x.  A ragged last tile is masked by Pallas.
    if N < 8:
        tm = N                                   # block == full dim (legal)
    else:
        tm = min(_round_up(tile_rows, 8), (N // 8) * 8)
        if tm >= 16 and pl.cdiv(N, tm) < 2:
            tm = _round_up(pl.cdiv(N, 2), 8)
    grid = (pl.cdiv(N, tm),)

    # VMEM budget: double-buffered x / out tiles, resident weight block
    # (counted twice for pipeline buffering), packed params, f32 intermediates.
    isz = jnp.dtype(in_dtype).itemsize
    osz = jnp.dtype(out_dtype).itemsize
    tile_bytes = (2 * tm * D_in * isz            # x tiles
                  + 2 * D_in * D_model * isz     # weight block
                  + 2 * tm * D_model * osz       # out tiles
                  + 2 * 3 * D_model * 4          # packed params
                  + 2 * tm * D_model * 4)        # f32 y / diff intermediates
    try:
        vmem_cap = int(pltpu.get_tpu_info().vmem_capacity_bytes)
    except Exception:
        vmem_cap = 64 << 20                      # conservative (v7x-sized)
    vmem_limit = int(min((vmem_cap * 3) // 4, max(32 << 20, 2 * tile_bytes)))

    cost = pl.CostEstimate(
        flops=2 * N * D_in * D_model + 10 * N * D_model,
        transcendentals=2 * N,                   # sqrt + reciprocal per row
        bytes_accessed=(N * D_in * isz + D_in * D_model * isz
                        + N * D_model * osz + 3 * D_model * 4),
    )

    # TODO(synk): for very large input_dim * d_model weights (v7x, 64 MiB
    # VMEM) add a K grid axis with a VMEM f32 accumulator (pl.when init and
    # LayerNorm finalize on the last K step) and single-buffer the constant
    # weight/param blocks (pl.Buffered(1)) to halve their resident footprint.
    out = pl.pallas_call(
        functools.partial(_src_embed_kernel, eps=eps, d_model=D_model),
        out_shape=jax.ShapeDtypeStruct((N, D_model), out_dtype),
        grid_spec=pltpu.PrefetchScalarGridSpec(
            num_scalar_prefetch=0,
            grid=grid,
            in_specs=[
                pl.BlockSpec((tm, D_in), lambda i: (i, 0)),
                pl.BlockSpec((D_in, D_model), lambda i: (0, 0)),
                pl.BlockSpec((3, D_model), lambda i: (0, 0)),
            ],
            out_specs=pl.BlockSpec((tm, D_model), lambda i: (i, 0)),
        ),
        compiler_params=pltpu.CompilerParams(
            dimension_semantics=("parallel",),
            vmem_limit_bytes=vmem_limit,
        ),
        cost_estimate=cost,
    )(x2, w2, params)

    return out.reshape(B, S, D_model)


def _reference(x, w, b, gamma, beta, eps=1e-6):
    y = jnp.einsum("bsi,io->bso", x, w) + b
    mean = y.mean(-1, keepdims=True)
    std = jnp.sqrt(((y - mean) ** 2).sum(-1, keepdims=True) / (y.shape[-1] - 1))
    return gamma * (y - mean) / (std + eps) + beta


if __name__ == "__main__":
    key = jax.random.PRNGKey(0)
    k_x, k_w, k_b = jax.random.split(key, 3)

    batch, seq, input_dim, d_model = 2, 8, 32, 64

    x = jax.random.normal(k_x, (batch, seq, input_dim), dtype=jnp.float32)
    # nn.Linear weight is [d_model, input_dim]; we store the transpose.
    w = jax.random.normal(k_w, (input_dim, d_model), dtype=jnp.float32) * 0.1
    b = jax.random.normal(k_b, (d_model,), dtype=jnp.float32) * 0.1
    # LayerNorm params initialized exactly like the module: ones / zeros.
    gamma = jnp.ones((d_model,), dtype=jnp.float32)
    beta = jnp.zeros((d_model,), dtype=jnp.float32)

    ref = _reference(x, w, b, gamma, beta)

    # f32 MXU path (only deviation: approx EUP reciprocal).
    out_f32 = jax.block_until_ready(
        src_embed(x, w, b, gamma, beta, compute_dtype=jnp.float32))
    assert out_f32.shape == (batch, seq, d_model)
    assert bool(jnp.all(jnp.isfinite(out_f32)))
    assert jnp.allclose(out_f32, ref, atol=5e-3, rtol=5e-3), "f32 path mismatch"

    # Default bf16-MXU path (half the input DMA bytes; f32 accumulation).
    out_bf16 = jax.block_until_ready(src_embed(x, w, b, gamma, beta))
    assert out_bf16.shape == (batch, seq, d_model)
    assert out_bf16.dtype == x.dtype
    assert bool(jnp.all(jnp.isfinite(out_bf16)))
    assert jnp.allclose(out_bf16, ref, atol=3e-2, rtol=3e-2), "bf16 path mismatch"

    print("KERNEL_OK")
</pallas_src>

<mosaic_0001>
module attributes {stable_mosaic.version = 11 : i64} {
  func.func @_src_embed_kernel(%arg0: i32, %arg1: memref<8x32xf32, #tpu.memory_space<vmem>>, %arg2: memref<32x64xf32, #tpu.memory_space<vmem>>, %arg3: memref<3x64xf32, #tpu.memory_space<vmem>>, %arg4: memref<8x64xf32, #tpu.memory_space<vmem>>) attributes {dimension_semantics = [#tpu.dimension_semantics<parallel>], iteration_bounds = array<i64: 2>, scalar_prefetch = 0 : i64, scratch_operands = 0 : i64, tpu.core_type = #tpu.core_type<tc>, window_params = [{transform_indices = @transform_0, window_bounds = array<i64: 8, 32>}, {pipeline_mode = #tpu.pipeline_mode<synchronous>, transform_indices = @transform_1, window_bounds = array<i64: 32, 64>}, {pipeline_mode = #tpu.pipeline_mode<synchronous>, transform_indices = @transform_2, window_bounds = array<i64: 3, 64>}, {transform_indices = @transform_3, window_bounds = array<i64: 8, 64>}]} {
    %c0 = arith.constant 0 : index
    %c0_0 = arith.constant 0 : index
    %0 = vector.load %arg1[%c0, %c0_0] : memref<8x32xf32, #tpu.memory_space<vmem>>, vector<8x32xf32>
    %c0_1 = arith.constant 0 : index
    %c0_2 = arith.constant 0 : index
    %1 = vector.load %arg2[%c0_1, %c0_2] : memref<32x64xf32, #tpu.memory_space<vmem>>, vector<32x64xf32>
    %cst = arith.constant dense<0.000000e+00> : vector<8x64xf32>
    %2 = tpu.matmul %0, %1, %cst {dimension_numbers = #tpu.dot_dimension_numbers<[1], [0], [0], [1], [0, 0, 1, 1], [], []>} : vector<8x32xf32>, vector<32x64xf32>, vector<8x64xf32> -> vector<8x64xf32>
    %c0_3 = arith.constant 0 : index
    %c0_4 = arith.constant 0 : index
    %3 = vector.load %arg3[%c0_3, %c0_4] : memref<3x64xf32, #tpu.memory_space<vmem>>, vector<1x64xf32>
    %4 = vector.broadcast %3 : vector<1x64xf32> to vector<8x64xf32>
    %5 = arith.addf %2, %4 : vector<8x64xf32>
    %cst_5 = arith.constant dense<0.000000e+00> : vector<8xf32>
    %6 = vector.multi_reduction <add>, %5, %cst_5 [1] : vector<8x64xf32> to vector<8xf32>
    %7 = vector.shape_cast %6 : vector<8xf32> to vector<8x1xf32>
    %cst_6 = arith.constant 1.562500e-02 : f32
    %8 = vector.broadcast %cst_6 : f32 to vector<8x1xf32>
    %9 = arith.mulf %7, %8 : vector<8x1xf32>
    %10 = vector.broadcast %9 : vector<8x1xf32> to vector<8x64xf32>
    %11 = arith.subf %5, %10 : vector<8x64xf32>
    %12 = arith.mulf %11, %11 : vector<8x64xf32>
    %cst_7 = arith.constant dense<0.000000e+00> : vector<8xf32>
    %13 = vector.multi_reduction <add>, %12, %cst_7 [1] : vector<8x64xf32> to vector<8xf32>
    %14 = vector.shape_cast %13 : vector<8xf32> to vector<8x1xf32>
    %cst_8 = arith.constant 0.0158730168 : f32
    %15 = vector.broadcast %cst_8 : f32 to vector<8x1xf32>
    %16 = arith.mulf %14, %15 : vector<8x1xf32>
    %17 = math.sqrt %16 : vector<8x1xf32>
    %cst_9 = arith.constant 9.99999997E-7 : f32
    %18 = vector.broadcast %cst_9 : f32 to vector<8x1xf32>
    %19 = arith.addf %17, %18 : vector<8x1xf32>
    %20 = tpu.reciprocal %19 {approx = true} : vector<8x1xf32> -> vector<8x1xf32>
    %c1 = arith.constant 1 : index
    %c0_10 = arith.constant 0 : index
    %21 = vector.load %arg3[%c1, %c0_10] : memref<3x64xf32, #tpu.memory_space<vmem>>, vector<1x64xf32>
    %22 = vector.broadcast %20 : vector<8x1xf32> to vector<8x64xf32>
    %23 = arith.mulf %11, %22 : vector<8x64xf32>
    %24 = vector.broadcast %21 : vector<1x64xf32> to vector<8x64xf32>
    %25 = arith.mulf %24, %23 : vector<8x64xf32>
    %c2 = arith.constant 2 : index
    %c0_11 = arith.constant 0 : index
    %26 = vector.load %arg3[%c2, %c0_11] : memref<3x64xf32, #tpu.memory_space<vmem>>, vector<1x64xf32>
    %27 = vector.broadcast %26 : vector<1x64xf32> to vector<8x64xf32>
    %28 = arith.addf %25, %27 : vector<8x64xf32>
    %c0_12 = arith.constant 0 : index
    %c0_13 = arith.constant 0 : index
    %29 = vector.load %arg4[%c0_12, %c0_13] : memref<8x64xf32, #tpu.memory_space<vmem>>, vector<8x64xf32>
    tpu.vector_store %arg4[%c0_12, %c0_13], %28 {strides = array<i32>} : memref<8x64xf32, #tpu.memory_space<vmem>>, vector<8x64xf32>,
    return
  }
  func.func @transform_0(%arg0: i32) -> (i32, i32) {
    %c0_i32 = arith.constant 0 : i32
    %c0_i32_0 = arith.constant 0 : i32
    return %arg0, %c0_i32 : i32, i32
  }
  func.func @transform_1(%arg0: i32) -> (i32, i32) {
    %c0_i32 = arith.constant 0 : i32
    %c0_i32_0 = arith.constant 0 : i32
    %c0_i32_1 = arith.constant 0 : i32
    return %c0_i32, %c0_i32_0 : i32, i32
  }
  func.func @transform_2(%arg0: i32) -> (i32, i32) {
    %c0_i32 = arith.constant 0 : i32
    %c0_i32_0 = arith.constant 0 : i32
    %c0_i32_1 = arith.constant 0 : i32
    return %c0_i32, %c0_i32_0 : i32, i32
  }
  func.func @transform_3(%arg0: i32) -> (i32, i32) {
    %c0_i32 = arith.constant 0 : i32
    %c0_i32_0 = arith.constant 0 : i32
    return %arg0, %c0_i32 : i32, i32
  }
}

</mosaic_0001>

<bundles_post_ra>
// kernel: tpu_custom_call.1
= control target key start
LH: loop header
LB: loop body
LE: loop exit
PB: predicated region body
PF: predicated region fallthrough
CT: control target
= control target key end

     0   :  { %8 = vsyncpa [#allocation3], 0  ;;  %s895_s0 = inlined_call_operand.hbm [shape: f32[16,32], index: 0, kind: input, shape index: {}]   ;;  %s896_s1 = inlined_call_operand.hbm [shape: f32[32,64], index: 1, kind: input, shape index: {}]   ;;  %s897_s2 = inlined_call_operand.hbm [shape: f32[3,64], index: 2, kind: input, shape index: {}]   ;;  %s898_s3 = inlined_call_operand.hbm [shape: f32[16,64], index: 3, kind: output, shape index: {}]  }
   0x1   :  { %10 = vsyncpa [#allocation3 + $0x1], 0 }
   0x2   :  { %11 = vsyncpa [#allocation6], 0 }
   0x3   :  { %12 = vsyncpa [#allocation4], 0 }
   0x4   :  { %14 = vsyncpa [#allocation4 + $0x1], 0  ;;  %s723_s12 = smov 0   ;;  %s725_s13 = smov 0  }
   0x5   :  { %s727_s14 = smov 0   ;;  %s729_s15 = smov 0  }
   0x6 LB: > { %s744_s16 = sadd.s32 4294967295, %s693_s15   ;;  %s434_s17 = sadd.s32 4294967294, %s693_s15   ;;  %s693_s15 = sphi %s729_s15, %s920_s15   ;;  %s689_s14 = sphi %s727_s14, %s919_s14   ;;  %s685_s13 = sphi %s725_s13, %s918_s13   ;;  %s681_s12 = sphi %s723_s12, %s917_s12  }
   0x7   : > { %p40_p0 = scmp.ne.s32.totalorder %s685_s13, %s681_s12  ;;  %p899_p1 = scmp.eq.s32.totalorder %s744_s16, 0 }
   0x8   : > { %p112_p3 = scmp.eq.s32.totalorder %s434_s17, 1  ;;  %p435_p5 = scmp.ge.s32.totalorder %s693_s15, 1 }
   0x9   : > { %p753_p4 = por %p899_p1, %p40_p0  ;;  %p119_p7 = scmp.lt.s32.totalorder %s693_s15, 3 }
   0xa   : > { %p758_p6 = por %p112_p3, %p40_p0  ;;  %s695_s21 = smov [#allocation5]  }
   0xb   : > { %s903_s18 = scalar_select %p753_p4, 1, 0 }
   0xc   : > { %s904_s19 = scalar_select %p758_p6, 1, 0 }
   0xd   : > { %p763_p8 = pnand %p435_p5, %p119_p7  ;;  %s131_s22 = sshll.u32 %s695_s21, 4  ;;  %s132_s22 = int_to_ptr.vmem [resolvable:$true] %s131_s22 }
   0xe   : > { %s696_s24 = smov [#allocation7]   ;;  %s556_s26 = scalar_lea.vmem %s132_s22, 512 }
   0xf   : > { %s905_s20 = scalar_select %p763_p8, 1, 0 }
  0x10   : > { %p482_p9 = pneg %p763_p8  ;;  %s145_s25 = sshll.u32 %s696_s24, 4  ;;  %s146_s25 = int_to_ptr.vmem [resolvable:$true] %s145_s25 }
  0x11   : > { %p557_p13 = scmp.ne.s32.totalorder %s132_s22, %s556_s26  ;;  %p564_p5 = scmp.lt.s32.totalorder %s132_s22, %s132_s22 }
  0x12   : > { %p772_p11 = pnand %p482_p9, %p899_p1  ;;  %p565_p7 = scmp.lt.s32.totalorder %s556_s26, %s556_s26 }
  0x14   : > { %p547_p12 = pneg %p772_p11  ;;  %p566_p10 = por %p565_p7, %p564_p5 }
  0x16   : > { %p559_p0 = pnand %p557_p13, %p547_p12 }
  0x18   : > { %p560_p3 = pneg %p559_p0 }
  0x1a   : > { %p567_p9 = pnand %p566_p10, %p560_p3 }
  0x1c   : > { %570 = shalt.err (!%p567_p9)
}
  0x1d   : > { %s697_s27 = smov 128   ;;  %s698_s28 = smov 8  }
  0x1e   : > { %485 = dma.hbm_to_vmem [thread:$0]  (!%p772_p11), %s896_s1, 512, %s132_s22, [#allocation6], %s697_s27, %s697_s27, %s698_s28  }
  0x1f   : > { %s582_s4 = scalar_lea.vmem %s146_s25, 64  ;;  %p590_p2 = scmp.lt.s32.totalorder %s146_s25, %s146_s25 }
  0x20   : > { %p583_p1 = scmp.ne.s32.totalorder %s146_s25, %s582_s4  ;;  %p591_p6 = scmp.lt.s32.totalorder %s582_s4, %s582_s4 }
  0x22   : > { %p585_p13 = pnand %p583_p1, %p547_p12  ;;  %p592_p5 = por %p591_p6, %p590_p2 }
  0x24   : > { %p586_p0 = pneg %p585_p13 }
  0x26   : > { %p593_p10 = pnand %p592_p5, %p586_p0 }
  0x28   : > { %596 = shalt.err (!%p593_p10)
}
  0x29   : > { %488 = dma.hbm_to_vmem [thread:$0]  (!%p772_p11), %s897_s2, 64, %s146_s25, [#allocation6]  }
  0x2a   : > { %s795_s7 = sadd.s32 1, %s693_s15   ;;  %s27_s8 = sadd.s32 1, %s689_s14 }
  0x2b   : > { %s24_s9 = ssub.s32 %s693_s15, %s795_s7  ;;  %p34_p1 = scmp.ne.s32.totalorder %s689_s14, %s685_s13 }
  0x2c   : > { %p25_p2 = scmp.eq.s32.totalorder %s24_s9, 0  ;;  %p35_p6 = scmp.eq.s32.totalorder %s693_s15, 0 }
  0x2d   : > { %p907_p12 = scmp.eq.s32.totalorder %s744_s16, 1  ;;  %p499_p7 = scmp.lt.s32.totalorder %s693_s15, 2 }
  0x2e   : > { %s811_s11 = scalar_select %p25_p2, %s689_s14, %s27_s8  }
  0x2f   : > { %p805_p3 = por %p907_p12, %p34_p1  ;;  %p36_p9 = por %p35_p6, %p34_p1 }
  0x30   : > { %s156_s17 = sand.u32 1, %s689_s14   ;;  %s440_s22 = sshll.u32 %s693_s15, 7 }
  0x31   : > { %s908_s10 = scalar_select %p805_p3, 1, 0 }
  0x32   : > { %s439_s21 = sshll.u32 %s156_s17, 3  ;;  %s818_s25 = scalar_lea.hbm %s895_s0, %s440_s22 }
  0x33   : > { %s160_s26 = scalar_lea.vmem [#allocation2], %s439_s21  ;;  %p820_p11 = pnand %p499_p7, %p36_p9 }
  0x34   : > { %s167_s27 = sshll.u32 %s160_s26, 4  ;;  %s157_s29 = scalar_lea.sflag [#allocation3], %s156_s17  ;;  %s168_s27 = int_to_ptr.vmem [resolvable:$true] %s167_s27 }
  0x35   : > { %s597_s30 = scalar_lea.hbm %s818_s25, 128  ;;  %p599_p0 = pneg %p820_p11 }
  0x36   : > { %p598_p13 = scmp.ne.s32.totalorder %s818_s25, %s597_s30  ;;  %s602_s6 = scalar_lea.hbm %s895_s0, 256 }
  0x37   : > { %p603_p1 = scmp.lt.s32.totalorder %s818_s25, %s895_s0  ;;  %p604_p2 = scmp.lt.s32.totalorder %s602_s6, %s597_s30 }
  0x38   : > { %p600_p5 = pnand %p599_p0, %p598_p13 }
  0x39   : > { %p605_p6 = por %p604_p2, %p603_p1 }
  0x3a   : > { %p601_p10 = pneg %p600_p5 }
  0x3c   : > { %p606_p12 = pnand %p605_p6, %p601_p10 }
  0x3e   : > { %609 = shalt.err (!%p606_p12)
}
  0x3f   : > { %s610_s21 = scalar_lea.vmem %s168_s27, 128  ;;  %s699_s17 = smov [#allocation2]  }
  0x40   : > { %p611_p7 = scmp.ne.s32.totalorder %s168_s27, %s610_s21  ;;  %s615_s22 = sshll.u32 %s699_s17, 4  ;;  %s616_s22 = int_to_ptr.vmem [resolvable:$false] %s615_s22 }
  0x41   : > { %s617_s23 = scalar_lea.vmem %s616_s22, 256  ;;  %p618_p13 = scmp.lt.s32.totalorder %s168_s27, %s616_s22 }
  0x42   : > { %p613_p9 = pnand %p611_p7, %p599_p0  ;;  %p619_p5 = scmp.lt.s32.totalorder %s617_s23, %s610_s21 }
  0x44   : > { %p614_p3 = pneg %p613_p9  ;;  %p620_p4 = por %p619_p5, %p618_p13 }
  0x46   : > { %p621_p8 = pnand %p620_p4, %p614_p3 }
  0x48   : > { %624 = shalt.err (!%p621_p8)
}
  0x49   : > { %492 = dma.hbm_to_vmem [thread:$0]  (!%p820_p11), %s818_s25, 128, %s168_s27, %s157_s29  }
  0x4a   : > { %p910_p10 = scmp.ne.s32.totalorder %s905_s20, 0 }
  0x4b   : > { %s841_s24 = sand.u32 (!%p910_p10), 1, %s685_s13   ;;  %p911_p4 = scmp.ne.s32.totalorder (!%p910_p10), %s903_s18, 0 }
  0x4c   : > { %176 = sbr.rel (%p910_p10) target bundleno = 628 (0x274), region = 32  ;;  %s442_s26 = sshll.u32 (!%p910_p10), %s841_s24, 3 }
  0x4d   : > { %s179_s30 = scalar_lea.sflag (!%p910_p10), [#allocation3], %s841_s24  ;;  %s182_s4 = scalar_lea.vmem (!%p910_p10), [#allocation2], %s442_s26 }
  0x51   : > { %668 = dma.done.wait (%p911_p4), %s179_s30, 128  }
  0x52   : > { %670 = vsyncadd (%p911_p4), %s179_s30, 4294967168  ;;  %p912_p8 = scmp.eq.s32.totalorder %s744_s16, 0 }
  0x54   : > { %672 = dma.done.wait (%p912_p8), [#allocation6], 576   ;;  %p913_p3 = pmov %p912_p8 }
  0x55   : > { %v700_v0 = vmov 0.0   ;;  %vm701_vm0 = vmmov 0   ;;  %v217_v1 = vld [vmem:[#allocation5 + $0x18] sm:$0xff]  ;;  %v216_v2 = vld [vmem:[#allocation5 + $0x10] sm:$0xff]  ;;  %v215_v3 = vld [vmem:[#allocation5 + $0x8] sm:$0xff]  ;;  %vm223_vm1 = vcmask 261120  }
  0x56   : > { %674 = vsyncadd (%p913_p3), [#allocation6], 4294966720  ;;  %459 = vmatprep.subr.mxu0 %v700_v0  ;;  %467 = vmatprep.mubr.msk.f32.mxu0 %vm701_vm0, %v700_v0  ;;  %v214_v4 = vld [vmem:[#allocation5] sm:$0xff]  ;;  %v213_v5 = vld [vmem:[%s182_s4] sm:$0xff]  ;;  %vm297_vm2 = vcmask 523264   ;;  %s451_s18 = sshll.u32 %s744_s16, 7 }
  0x57   : > { %460 = vmatpush3.msra.mxu0 %v217_v1  ;;  %v446_v6 = vld [vmem:[#allocation7] ss:$0 sm:$0xff]  ;;  %v448_v25 = vld [vmem:[#allocation7 + $0x1] ss:$0 sm:$0xff]  ;;  %v449_v27 = vld [vmem:[#allocation7 + $0x2] ss:$0 sm:$0xff]  ;;  %s343_s29 = scalar_lea.hbm %s898_s3, %s451_s18 }
  0x58   : > { %461 = vmatprep.subr.mxu0 %v700_v0  ;;  %s212_s20 = scalar_lea.vmem [#allocation8], %s442_s26  ;;  %s332_s5 = scalar_lea.sflag [#allocation4], %s841_s24 }
  0x59   : > { %462 = vmatpush3.msra.mxu0 %v216_v2  ;;  %s345_s25 = sshll.u32 %s212_s20, 4  ;;  %p914_p0 = scmp.ne.s32.totalorder %s908_s10, 0  ;;  %s346_s25 = int_to_ptr.vmem [resolvable:$true] %s345_s25 }
  0x5a   : > { %463 = vmatprep.subr.mxu0 %v700_v0  ;;  %s625_s6 = scalar_lea.vmem %s346_s25, 128  ;;  %s702_s8 = smov [#allocation8]  }
  0x5b   : > { %464 = vmatpush3.msra.mxu0 %v215_v3  ;;  %p626_p11 = scmp.ne.s32.totalorder %s346_s25, %s625_s6  ;;  %s629_s16 = sshll.u32 %s702_s8, 4  ;;  %s630_s16 = int_to_ptr.vmem [resolvable:$false] %s629_s16 }
  0x5c   : > { %465 = vmatprep.subr.mxu0 %v700_v0  ;;  %s631_s9 = scalar_lea.vmem %s630_s16, 256  ;;  %p632_p6 = scmp.lt.s32.totalorder %s346_s25, %s630_s16 }
  0x5d   : > { %466 = vmatpush3.msra.mxu0 %v214_v4  ;;  %p627_p1 = pnand %p626_p11, %p914_p0  ;;  %p633_p12 = scmp.lt.s32.totalorder %s631_s9, %s625_s6 }
  0x5e   : > { %468 = vmatmul.mubr.msk.f32.vlgmr.msra.gmra.mxu0 %vm223_vm1, %v213_v5 }
  0x5f   : > { %p628_p2 = pneg %p627_p1  ;;  %p634_p7 = por %p633_p12, %p632_p6 }
  0x61   : > { %p635_p9 = pnand %p634_p7, %p628_p2 }
 0x11e   : > { %v293_v7 = vpop.f32.mrf.mxu0 }
 0x11f   : > { %v294_v8 = vadd.f32 %v446_v6, %v293_v7 }
 0x120   : > { %v469_v9 = vpop.f32.mrf.mxu0 }
 0x121   : > { %v298_v10 = vsel %vm297_vm2, %v294_v8, 0.0 }
 0x122   : > { %299 = vadd.xlane.f32.xlu0 %v298_v10 }
 0x1ab   : > { %v300_v11 = vpop.xlane.xlu0 %299 }
 0x1ac   : > { %v301_v12 = vmul.f32 0.015625, %v300_v11 }
 0x1ae   : > { %v302_v13 = vsub.f32 %v294_v8, %v301_v12 }
 0x1b0   : > { %v303_v14 = vmul.f32 %v302_v13, %v302_v13 }
 0x1b2   : > { %v304_v15 = vsel %vm297_vm2, %v303_v14, 0.0 }
 0x1b3   : > { %305 = vadd.xlane.f32.xlu0 %v304_v15 }
 0x23c   : > { %v306_v16 = vpop.xlane.xlu0 %305 }
 0x23d   : > { %v307_v17 = vmul.f32 0.015873017, %v306_v16 }
 0x23f   : > { %541 = vrsqrt.f32 %v307_v17  ;;  %vm310_vm3 = vcmp.eq.f32.partialorder %v307_v17, inf  ;;  %v313_v20 = vand.u32 2147483648, %v307_v17  ;;  %vm312_vm4 = vcmp.eq.f32.partialorder %v307_v17, 0.0 }
 0x24c   : > { %v542_v18 = vpop.eup %541 }
 0x24d   : > { %v309_v19 = vmul.f32 %v542_v18, %v307_v17 }
 0x24f   : > { %v311_v21 = vsel %vm310_vm3, %v307_v17, %v309_v19 }
 0x250   : > { %v314_v22 = vsel %vm312_vm4, %v313_v20, %v311_v21 }
 0x251   : > { %v315_v23 = vadd.f32 1e-06, %v314_v22 }
 0x253   : > { %543 = vrcp.f32 %v315_v23 }
 0x260   : > { %v544_v24 = vpop.eup %543 }
 0x261   : > { %v318_v26 = vmul.f32 %v544_v24, %v302_v13 }
 0x263   : > { %v323_v28 = vmul.f32 %v448_v25, %v318_v26 }
 0x265   : > { %v329_v29 = vadd.f32 %v449_v27, %v323_v28 }
 0x267   : > { %330 = vst.msk [vmem:[%s212_s20] sm:$0xff] %vm297_vm2, %v329_v29 }
 0x268   : > { %638 = shalt.err (!%p635_p9)
}
 0x269   : > { %s639_s21 = scalar_lea.hbm %s343_s29, 128  ;;  %s643_s23 = scalar_lea.hbm %s898_s3, 256 }
 0x26a   : > { %p640_p13 = scmp.ne.s32.totalorder %s343_s29, %s639_s21  ;;  %p644_p4 = scmp.lt.s32.totalorder %s343_s29, %s898_s3 }
 0x26b   : > { %p645_p8 = scmp.lt.s32.totalorder %s643_s23, %s639_s21 }
 0x26c   : > { %p641_p5 = pnand %p640_p13, %p914_p0 }
 0x26d   : > { %p646_p3 = por %p645_p8, %p644_p4 }
 0x26e   : > { %p642_p10 = pneg %p641_p5 }
 0x270   : > { %p647_p11 = pnand %p646_p3, %p642_p10 }
 0x272   : > { %650 = shalt.err (!%p647_p11)
}
 0x273   : > { %480 = dma.vmem_to_hbm [thread:$0]  (%p914_p0), %s346_s25, 128, %s343_s29, %s332_s5  }
 0x274 PF: > { %s357_s30 = sand.u32 1, %s681_s12   ;;  %p915_p1 = scmp.ne.s32.totalorder %s904_s19, 0 }
 0x275   : > { %p916_p2 = scmp.ge.s32.totalorder %s693_s15, 2  ;;  %s358_s4 = scalar_lea.sflag [#allocation4], %s357_s30 }
 0x277   : > { %p494_p6 = pnand %p916_p2, %p915_p1 }
 0x279   : > { %p495_p12 = pneg %p494_p6 }
 0x27b   : > { %676 = dma.done.wait (%p495_p12), %s358_s4, 128  }
 0x27c   : > { %678 = vsyncadd (%p495_p12), %s358_s4, 4294967168  ;;  %p17_p7 = scmp.ge.s32.totalorder %s795_s7, 4   ;;  %s917_s12 = smov %s685_s13 }
 0x27d   : > { %s918_s13 = smov %s689_s14  ;;  %s919_s14 = smov %s811_s11 }
 0x27e   : > { %s920_s15 = smov %s795_s7  ;;  %19 = sbr.rel (!%p17_p7) target bundleno = 6 (0x6), region = 85 }
 0x283   :  { %363 = vsyncpa [#allocation3], 1 }
 0x284   :  { %365 = vsyncpa [#allocation3 + $0x1], 1 }
 0x285   :  { %366 = vsyncpa [#allocation6], 1 }
 0x286   :  { %367 = vsyncpa [#allocation4], 1 }
 0x287   :  { %369 = vsyncpa [#allocation4 + $0x1], 1 }

</bundles_post_ra>
